<compile_context>
chip_gen: v6e
topology: v6e:2x2x1
jax: 0.10.0
libtpu: 0.0.40
codegen_flags: <defaults>
</compile_context>

<pallas_src>
import jax
import jax.numpy as jnp
from jax.experimental import pallas as pl
from jax.experimental.pallas import tpu as pltpu


def senet_kernel(x_ref, w1_ref, b1_ref, w2_ref, b2_ref, v_ref, a_ref):
    x = x_ref[...]                                        # (BB, F, D)

    # Squeeze: max over the embedding dim.
    z = jnp.max(x, axis=-1)                               # (BB, F)

    # Excitation MLP, batched over the BB rows of this block.
    h = jnp.dot(z, w1_ref[...], preferred_element_type=jnp.float32) + b1_ref[...]
    h = jnp.maximum(h, 0.0)                               # (BB, T)
    a = jnp.dot(h, w2_ref[...], preferred_element_type=jnp.float32) + b2_ref[...]
    a = jnp.maximum(a, 0.0)                               # (BB, F)

    # Re-weight embeddings (broadcast over D) and emit dense attention weights.
    v_ref[...] = (a[:, :, None] * x).astype(v_ref.dtype)  # (BB, F, D)
    a_ref[...] = a.astype(a_ref.dtype)                    # (BB, F)  lane/sublane dense


def _pick_batch_block(B, F, D, itemsize=4):
    """Pick a batch block BB that keeps double-buffered tiles well inside scoped VMEM."""
    lane_d = -(-D // 128) * 128            # lane-padded last dim of x / V tiles
    lane_f = -(-F // 128) * 128            # lane-padded last dim of the A tile
    per_row = 2 * (2 * F * lane_d + lane_f) * itemsize   # x + V + A, double-buffered
    budget = 12 * 1024 * 1024              # safe under v5e's 16 MiB scoped default
    bb = max(1, budget // per_row)
    bb = min(bb, 2048)
    if bb >= B:
        return B
    return max(8, (bb // 8) * 8)           # sublane-align the (BB, F) A-output block


def senet_layer(x_emb, w1, b1, w2, b2, batch_block=None):
    """x_emb: (B, F, D) float32. Returns (V_embed (B,F,D), A_weight (B,F,1))."""
    B, F, D = x_emb.shape
    T = w1.shape[1]
    BB = batch_block if batch_block is not None else _pick_batch_block(B, F, D)
    BB = min(BB, B)
    grid = (pl.cdiv(B, BB),)

    grid_spec = pltpu.PrefetchScalarGridSpec(
        num_scalar_prefetch=0,
        grid=grid,
        in_specs=[
            pl.BlockSpec((BB, F, D), lambda b: (b, 0, 0)),   # x_emb, BB rows per step
            pl.BlockSpec((F, T), lambda b: (0, 0)),           # W1 (block-invariant)
            pl.BlockSpec((1, T), lambda b: (0, 0)),           # b1 (block-invariant)
            pl.BlockSpec((T, F), lambda b: (0, 0)),           # W2 (block-invariant)
            pl.BlockSpec((1, F), lambda b: (0, 0)),           # b2 (block-invariant)
        ],
        out_specs=[
            pl.BlockSpec((BB, F, D), lambda b: (b, 0, 0)),    # V_embed
            pl.BlockSpec((BB, F), lambda b: (b, 0)),          # A_weight (dense 2-D)
        ],
    )

    v_embed, a_weight = pl.pallas_call(
        senet_kernel,
        out_shape=(
            jax.ShapeDtypeStruct((B, F, D), x_emb.dtype),
            jax.ShapeDtypeStruct((B, F), x_emb.dtype),
        ),
        grid_spec=grid_spec,
        compiler_params=pltpu.CompilerParams(
            dimension_semantics=("parallel",),
            vmem_limit_bytes=32 * 1024 * 1024,
        ),
    )(x_emb, w1, b1, w2, b2)

    # Free layout plumbing in the wrapper: match PyTorch's (B, F, 1) A_weight.
    return v_embed, a_weight[:, :, None]


def senet_reference(x_emb, w1, b1, w2, b2):
    # Pure-JAX reference mirroring the PyTorch forward.
    z = jnp.max(x_emb, axis=2, keepdims=True)             # (B, F, 1)
    z = jnp.swapaxes(z, 1, 2)                              # (B, 1, F)
    h = jax.nn.relu(z @ w1 + b1)                           # (B, 1, T)
    a = jax.nn.relu(h @ w2 + b2)                           # (B, 1, F)
    a = jnp.swapaxes(a, 1, 2)                              # (B, F, 1)
    return a * x_emb, a


def _make_inputs(key, B, F, T, D):
    kx, kw1, kb1, kw2, kb2 = jax.random.split(key, 5)
    x_emb = jax.random.normal(kx, (B, F, D), dtype=jnp.float32)
    # nn.Linear(field_length, temp_dim): weight (T, F), bias (T,) -> stored as (F, T)
    w1 = jax.random.normal(kw1, (F, T), dtype=jnp.float32) * 0.1
    b1 = jax.random.normal(kb1, (1, T), dtype=jnp.float32) * 0.1
    # nn.Linear(temp_dim, field_length): weight (F, T), bias (F,) -> stored as (T, F)
    w2 = jax.random.normal(kw2, (T, F), dtype=jnp.float32) * 0.1
    b2 = jax.random.normal(kb2, (1, F), dtype=jnp.float32) * 0.1
    return x_emb, w1, b1, w2, b2


if __name__ == "__main__":
    # Small shapes: batch=2, field_length=8, emb_dim=32, ratio=1 -> temp_dim=8
    B, F, D = 2, 8, 32
    ratio = 1
    T = max(1, F // ratio)

    key = jax.random.PRNGKey(0)
    x_emb, w1, b1, w2, b2 = _make_inputs(key, B, F, T, D)

    v_embed, a_weight = senet_layer(x_emb, w1, b1, w2, b2)
    jax.block_until_ready((v_embed, a_weight))

    v_ref, a_ref = senet_reference(x_emb, w1, b1, w2, b2)
    assert jnp.allclose(v_embed, v_ref, atol=1e-5, rtol=1e-5)
    assert jnp.allclose(a_weight, a_ref, atol=1e-5, rtol=1e-5)

    # Exercise the multi-block batch-tiled path (grid > 1) with a forced block size.
    B2 = 24
    x2, w1b, b1b, w2b, b2b = _make_inputs(jax.random.PRNGKey(0), B2, F, T, D)
    v2, a2 = senet_layer(x2, w1b, b1b, w2b, b2b, batch_block=8)
    jax.block_until_ready((v2, a2))
    v2_ref, a2_ref = senet_reference(x2, w1b, b1b, w2b, b2b)
    assert jnp.allclose(v2, v2_ref, atol=1e-5, rtol=1e-5)
    assert jnp.allclose(a2, a2_ref, atol=1e-5, rtol=1e-5)

    print("KERNEL_OK")
</pallas_src>

<mosaic_0001>
module attributes {stable_mosaic.version = 11 : i64} {
  func.func @senet_kernel(%arg0: i32, %arg1: memref<2x8x32xf32, #tpu.memory_space<vmem>>, %arg2: memref<8x8xf32, #tpu.memory_space<vmem>>, %arg3: memref<1x8xf32, #tpu.memory_space<vmem>>, %arg4: memref<8x8xf32, #tpu.memory_space<vmem>>, %arg5: memref<1x8xf32, #tpu.memory_space<vmem>>, %arg6: memref<2x8x32xf32, #tpu.memory_space<vmem>>, %arg7: memref<2x8xf32, #tpu.memory_space<vmem>>) attributes {dimension_semantics = [#tpu.dimension_semantics<parallel>], iteration_bounds = array<i64: 1>, scalar_prefetch = 0 : i64, scratch_operands = 0 : i64, tpu.core_type = #tpu.core_type<tc>, window_params = [{transform_indices = @transform_0, window_bounds = array<i64: 2, 8, 32>}, {pipeline_mode = #tpu.pipeline_mode<synchronous>, transform_indices = @transform_1, window_bounds = array<i64: 8, 8>}, {pipeline_mode = #tpu.pipeline_mode<synchronous>, transform_indices = @transform_2, window_bounds = array<i64: 1, 8>}, {pipeline_mode = #tpu.pipeline_mode<synchronous>, transform_indices = @transform_3, window_bounds = array<i64: 8, 8>}, {pipeline_mode = #tpu.pipeline_mode<synchronous>, transform_indices = @transform_4, window_bounds = array<i64: 1, 8>}, {transform_indices = @transform_5, window_bounds = array<i64: 2, 8, 32>}, {transform_indices = @transform_6, window_bounds = array<i64: 2, 8>}]} {
    %c0 = arith.constant 0 : index
    %c0_0 = arith.constant 0 : index
    %c0_1 = arith.constant 0 : index
    %0 = vector.load %arg1[%c0, %c0_0, %c0_1] : memref<2x8x32xf32, #tpu.memory_space<vmem>>, vector<2x8x32xf32>
    %cst = arith.constant dense<0xFF800000> : vector<2x8xf32>
    %1 = vector.multi_reduction <maximumf>, %0, %cst [2] : vector<2x8x32xf32> to vector<2x8xf32>
    %c0_2 = arith.constant 0 : index
    %c0_3 = arith.constant 0 : index
    %2 = vector.load %arg2[%c0_2, %c0_3] : memref<8x8xf32, #tpu.memory_space<vmem>>, vector<8x8xf32>
    %cst_4 = arith.constant dense<0.000000e+00> : vector<2x8xf32>
    %3 = tpu.matmul %1, %2, %cst_4 {dimension_numbers = #tpu.dot_dimension_numbers<[1], [0], [0], [1], [0, 0, 1, 1], [], []>} : vector<2x8xf32>, vector<8x8xf32>, vector<2x8xf32> -> vector<2x8xf32>
    %c0_5 = arith.constant 0 : index
    %c0_6 = arith.constant 0 : index
    %4 = vector.load %arg3[%c0_5, %c0_6] : memref<1x8xf32, #tpu.memory_space<vmem>>, vector<1x8xf32>
    %5 = vector.broadcast %4 : vector<1x8xf32> to vector<2x8xf32>
    %6 = arith.addf %3, %5 : vector<2x8xf32>
    %cst_7 = arith.constant 0.000000e+00 : f32
    %7 = vector.broadcast %cst_7 : f32 to vector<2x8xf32>
    %8 = arith.maximumf %6, %7 : vector<2x8xf32>
    %c0_8 = arith.constant 0 : index
    %c0_9 = arith.constant 0 : index
    %9 = vector.load %arg4[%c0_8, %c0_9] : memref<8x8xf32, #tpu.memory_space<vmem>>, vector<8x8xf32>
    %cst_10 = arith.constant dense<0.000000e+00> : vector<2x8xf32>
    %10 = tpu.matmul %8, %9, %cst_10 {dimension_numbers = #tpu.dot_dimension_numbers<[1], [0], [0], [1], [0, 0, 1, 1], [], []>} : vector<2x8xf32>, vector<8x8xf32>, vector<2x8xf32> -> vector<2x8xf32>
    %c0_11 = arith.constant 0 : index
    %c0_12 = arith.constant 0 : index
    %11 = vector.load %arg5[%c0_11, %c0_12] : memref<1x8xf32, #tpu.memory_space<vmem>>, vector<1x8xf32>
    %12 = vector.broadcast %11 : vector<1x8xf32> to vector<2x8xf32>
    %13 = arith.addf %10, %12 : vector<2x8xf32>
    %cst_13 = arith.constant 0.000000e+00 : f32
    %14 = vector.broadcast %cst_13 : f32 to vector<2x8xf32>
    %15 = arith.maximumf %13, %14 : vector<2x8xf32>
    %16 = vector.shape_cast %15 : vector<2x8xf32> to vector<2x8x1xf32>
    %17 = vector.broadcast %16 : vector<2x8x1xf32> to vector<2x8x32xf32>
    %18 = arith.mulf %17, %0 : vector<2x8x32xf32>
    %c0_14 = arith.constant 0 : index
    %c0_15 = arith.constant 0 : index
    %c0_16 = arith.constant 0 : index
    %19 = vector.load %arg6[%c0_14, %c0_15, %c0_16] : memref<2x8x32xf32, #tpu.memory_space<vmem>>, vector<2x8x32xf32>
    tpu.vector_store %arg6[%c0_14, %c0_15, %c0_16], %18 {strides = array<i32>} : memref<2x8x32xf32, #tpu.memory_space<vmem>>, vector<2x8x32xf32>,
    %c0_17 = arith.constant 0 : index
    %c0_18 = arith.constant 0 : index
    %20 = vector.load %arg7[%c0_17, %c0_18] : memref<2x8xf32, #tpu.memory_space<vmem>>, vector<2x8xf32>
    tpu.vector_store %arg7[%c0_17, %c0_18], %15 {strides = array<i32>} : memref<2x8xf32, #tpu.memory_space<vmem>>, vector<2x8xf32>,
    return
  }
  func.func @transform_0(%arg0: i32) -> (i32, i32, i32) {
    %c0_i32 = arith.constant 0 : i32
    %c0_i32_0 = arith.constant 0 : i32
    %c0_i32_1 = arith.constant 0 : i32
    return %arg0, %c0_i32, %c0_i32_0 : i32, i32, i32
  }
  func.func @transform_1(%arg0: i32) -> (i32, i32) {
    %c0_i32 = arith.constant 0 : i32
    %c0_i32_0 = arith.constant 0 : i32
    %c0_i32_1 = arith.constant 0 : i32
    return %c0_i32, %c0_i32_0 : i32, i32
  }
  func.func @transform_2(%arg0: i32) -> (i32, i32) {
    %c0_i32 = arith.constant 0 : i32
    %c0_i32_0 = arith.constant 0 : i32
    %c0_i32_1 = arith.constant 0 : i32
    return %c0_i32, %c0_i32_0 : i32, i32
  }
  func.func @transform_3(%arg0: i32) -> (i32, i32) {
    %c0_i32 = arith.constant 0 : i32
    %c0_i32_0 = arith.constant 0 : i32
    %c0_i32_1 = arith.constant 0 : i32
    return %c0_i32, %c0_i32_0 : i32, i32
  }
  func.func @transform_4(%arg0: i32) -> (i32, i32) {
    %c0_i32 = arith.constant 0 : i32
    %c0_i32_0 = arith.constant 0 : i32
    %c0_i32_1 = arith.constant 0 : i32
    return %c0_i32, %c0_i32_0 : i32, i32
  }
  func.func @transform_5(%arg0: i32) -> (i32, i32, i32) {
    %c0_i32 = arith.constant 0 : i32
    %c0_i32_0 = arith.constant 0 : i32
    %c0_i32_1 = arith.constant 0 : i32
    return %arg0, %c0_i32, %c0_i32_0 : i32, i32, i32
  }
  func.func @transform_6(%arg0: i32) -> (i32, i32) {
    %c0_i32 = arith.constant 0 : i32
    %c0_i32_0 = arith.constant 0 : i32
    return %arg0, %c0_i32 : i32, i32
  }
}

</mosaic_0001>

<bundles_post_ra>
// kernel: tpu_custom_call.1
= control target key start
LH: loop header
LB: loop body
LE: loop exit
PB: predicated region body
PF: predicated region fallthrough
CT: control target
= control target key end

     0   :  { %12 = vsyncpa [#allocation3], 0  ;;  %s514_s0 = inlined_call_operand.hbm [shape: f32[2,8,32], index: 0, kind: input, shape index: {}]   ;;  %s515_s1 = inlined_call_operand.hbm [shape: f32[8,8], index: 1, kind: input, shape index: {}]   ;;  %s516_s2 = inlined_call_operand.vmem [shape: f32[1,8], index: 2, kind: input, shape index: {}]   ;;  %s517_s3 = inlined_call_operand.hbm [shape: f32[8,8], index: 3, kind: input, shape index: {}]   ;;  %s518_s4 = inlined_call_operand.vmem [shape: f32[1,8], index: 4, kind: input, shape index: {}]   ;;  %s519_s5 = inlined_call_operand.hbm [shape: f32[2,8,32], index: 5, kind: output, shape index: {0}]   ;;  %s520_s6 = inlined_call_operand.hbm [shape: f32[2,8], index: 6, kind: output, shape index: {1}]  }
   0x1   :  { %13 = vsyncpa [#allocation6], 0 }
   0x2   :  { %14 = vsyncpa [#allocation4], 0 }
   0x3   :  { %15 = vsyncpa [#allocation10], 0  ;;  %s435_s21 = smov [#allocation5]   ;;  %s436_s23 = smov [#allocation2]  }
   0x4   :  { %s34_s22 = sshll.u32 %s435_s21, 4  ;;  %s21_s24 = sshll.u32 %s436_s23, 4  ;;  %s35_s22 = int_to_ptr.vmem [resolvable:$true] %s34_s22  ;;  %s22_s24 = int_to_ptr.vmem [resolvable:$true] %s21_s24 }
   0x5   :  { %s335_s25 = scalar_lea.vmem %s35_s22, 128  ;;  %p340_p1 = scmp.lt.s32.totalorder %s35_s22, %s35_s22 }
   0x6   :  { %p336_p0 = scmp.ne.s32.totalorder %s35_s22, %s335_s25  ;;  %p341_p2 = scmp.lt.s32.totalorder %s335_s25, %s335_s25 }
   0x8   :  { %p342_p3 = por %p341_p2, %p340_p1 }
   0xa   :  { %p343_p4 = pnand %p342_p3, %p336_p0 }
   0xc   :  { %346 = shalt.err (!%p343_p4)
}
   0xd   :  { %37 = dma.hbm_to_vmem [thread:$0]  %s515_s1, 128, %s35_s22, [#allocation6]  }
   0xe   :  { %s355_s28 = scalar_lea.vmem %s22_s24, 256  ;;  %p360_p6 = scmp.lt.s32.totalorder %s22_s24, %s22_s24 }
   0xf   :  { %p356_p5 = scmp.ne.s32.totalorder %s22_s24, %s355_s28  ;;  %p361_p7 = scmp.lt.s32.totalorder %s355_s28, %s355_s28 }
  0x11   :  { %p362_p8 = por %p361_p7, %p360_p6 }
  0x13   :  { %p363_p9 = pnand %p362_p8, %p356_p5 }
  0x15   :  { %366 = shalt.err (!%p363_p9)
}
  0x16   :  { %s437_s29 = smov 128   ;;  %s438_s30 = smov 8  }
  0x17   :  { %27 = dma.hbm_to_vmem [thread:$0]  %s514_s0, 256, %s22_s24, [#allocation3], %s437_s29, %s437_s29, %s438_s30  }
  0x18   :  { %s439_s9 = smov [#allocation7]  }
  0x19   :  { %s46_s10 = sshll.u32 %s439_s9, 4  ;;  %s47_s10 = int_to_ptr.vmem [resolvable:$true] %s46_s10 }
  0x1a   :  { %s375_s1 = scalar_lea.vmem %s47_s10, 128  ;;  %p380_p11 = scmp.lt.s32.totalorder %s47_s10, %s47_s10 }
  0x1b   :  { %p376_p10 = scmp.ne.s32.totalorder %s47_s10, %s375_s1  ;;  %p381_p12 = scmp.lt.s32.totalorder %s375_s1, %s375_s1 }
  0x1d   :  { %p382_p13 = por %p381_p12, %p380_p11 }
  0x1f   :  { %p383_p0 = pnand %p382_p13, %p376_p10 }
  0x21   :  { %386 = shalt.err (!%p383_p0)
}
  0x22   :  { %49 = dma.hbm_to_vmem [thread:$0]  %s517_s3, 128, %s47_s10, [#allocation6]  }
  0x23   :  { %427 = dma.done.wait [#allocation3], 256  }
  0x24   :  { %428 = vsyncadd [#allocation3], 4294967040 }
  0x25   :  { %429 = dma.done.wait [#allocation6], 256  }
  0x26   :  { %430 = vsyncadd [#allocation6], 4294967040  ;;  %vm63_vm0 = vcmask 261120   ;;  %v61_v0 = vld [vmem:[#allocation2] sm:$0xff]  ;;  %v491_v1 = vld [vmem:[#allocation2 + $0x8] sm:$0xff]  ;;  %v440_v5 = vmov 0.0   ;;  %v80_v6 = vlaneseq }
  0x27   :  { %v64_v2 = vsel %vm63_vm0, %v61_v0, -inf  ;;  %v67_v3 = vsel %vm63_vm0, %v491_v1, -inf  ;;  %v70_v4 = vld [vmem:[#allocation5] sm:$0xff]  ;;  %308 = vmatprep.subr.mxu0 %v440_v5  ;;  %vm441_vm1 = vmmov 0   ;;  %313 = vmatprep.subr.mxu1 %v440_v5  ;;  %vm90_vm2 = vcmask 1041409   ;;  %v166_v15 = vld [vmem:[#allocation7] sm:$0xff] }
  0x28   :  { %65 = vmax.xlane.f32.xlu0 %v64_v2  ;;  %310 = vmatprep.mubr.msk.f32.mxu0 %vm441_vm1, %v440_v5  ;;  %v81_v7 = vand.u32 127, %v80_v6  ;;  %v83_v8 = vshrl.u32 %v80_v6, 7  ;;  %vm92_vm3 = vcmask 64512   ;;  %v300_v16 = vld [vmem:[%s516_s2] ss:$0 sm:$0xff]  ;;  %s442_s15 = smov [#allocation9]  }
  0x29   :  { %309 = vmatpush3.msra.mxu0 %v70_v4  ;;  %315 = vmatprep.mubr.msk.f32.mxu1 %vm441_vm1, %v440_v5  ;;  %v302_v21 = vld [vmem:[%s518_s4] ss:$0 sm:$0xff]  ;;  %s286_s16 = sshll.u32 %s442_s15, 4  ;;  %vm266_vm4 = vcmask 58368   ;;  %s287_s16 = int_to_ptr.vmem [resolvable:$true] %s286_s16 }
  0x2a   :  { %v84_v10 = vsub.s32 %v81_v7, %v83_v8  ;;  %314 = vmatpush3.msra.mxu1 %v166_v15  ;;  %v250_v24 = vsub.s32 0, %v83_v8  ;;  %v257_v28 = vsub.s32 1, %v83_v8  ;;  %s387_s2 = scalar_lea.vmem %s287_s16, 32  ;;  %p392_p2 = scmp.lt.s32.totalorder %s287_s16, %s287_s16 }
  0x2b   :  { %p388_p1 = scmp.ne.s32.totalorder %s287_s16, %s387_s2  ;;  %p393_p3 = scmp.lt.s32.totalorder %s387_s2, %s387_s2 }
  0x2c   :  { %68 = vmax.xlane.f32.xlu0 %v67_v3 }
  0x2d   :  { %p394_p4 = por %p393_p3, %p392_p2 }
  0x2f   :  { %p395_p5 = pnand %p394_p4, %p388_p1 }
  0xb1   :  { %v66_v9 = vpop.xlane.xlu0 %65 }
  0xb2   :  { %v85_v12 = vrot.slane %v66_v9, %v84_v10 }
  0xb5   :  { %v69_v11 = vpop.xlane.xlu0 %68 }
  0xb6   :  { %v89_v13 = vrot.slane %v69_v11, %v84_v10 }
  0xb8   :  { %v91_v14 = vsel %vm90_vm2, %v89_v13, %v85_v12 }
  0xb9   :  { %311 = vmatmul.mubr.msk.f32.vlgmr.msra.gmra.mxu0 %vm92_vm3, %v91_v14 }
 0x179   :  { %v161_v17 = vpop.f32.mrf.mxu0 }
 0x17a   :  { %v162_v18 = vadd.f32 %v300_v16, %v161_v17 }
 0x17b   :  { %v312_v19 = vpop.f32.mrf.mxu0 }
 0x17c   :  { %v165_v20 = vmax.f32 %v162_v18, 0.0 }
 0x17e   :  { %316 = vmatmul.mubr.msk.f32.vlgmr.msra.gmra.mxu1 %vm92_vm3, %v165_v20 }
 0x23e   :  { %v243_v22 = vpop.f32.mrf.mxu1 }
 0x23f   :  { %v244_v23 = vadd.f32 %v302_v21, %v243_v22 }
 0x240   :  { %v317_v25 = vpop.f32.mrf.mxu1 }
 0x241   :  { %v247_v26 = vmax.f32 %v244_v23, 0.0 }
 0x243   :  { %v251_v27 = vrot.slane %v247_v26, %v250_v24  ;;  %267 = vst.msk [vmem:[#allocation9] sm:$0x3] %vm266_vm4, %v247_v26 }
 0x244   :  { %398 = shalt.err (!%p395_p5)
}
 0x245   :  { %289 = dma.vmem_to_hbm [thread:$0]  %s287_s16, 32, %s520_s6, [#allocation10]   ;;  %253 = vbcast.lane.b32.xlu1 %v251_v27, 256  ;;  %v258_v29 = vrot.slane %v247_v26, %v257_v28 }
 0x246   :  { %s443_s18 = smov [#allocation8]  }
 0x247   :  { %s273_s19 = sshll.u32 %s443_s18, 4  ;;  %s274_s19 = int_to_ptr.vmem [resolvable:$true] %s273_s19 }
 0x248   :  { %s407_s20 = scalar_lea.vmem %s274_s19, 256  ;;  %p412_p7 = scmp.lt.s32.totalorder %s274_s19, %s274_s19 }
 0x249   :  { %260 = vbcast.lane.b32.xlu1 %v258_v29, 256  ;;  %p408_p6 = scmp.ne.s32.totalorder %s274_s19, %s407_s20  ;;  %p413_p8 = scmp.lt.s32.totalorder %s407_s20, %s407_s20 }
 0x24b   :  { %p414_p9 = por %p413_p8, %p412_p7 }
 0x24d   :  { %p415_p10 = pnand %p414_p9, %p408_p6 }
 0x2b7   :  { %v254_v30 = vpop.permute.xlu1 %253 }
 0x2b8   :  { %v262_v31 = vmul.f32 %v254_v30, %v61_v0 }
 0x2ba   :  { %264 = vst.msk [vmem:[#allocation8] sm:$0xff] %vm63_vm0, %v262_v31 }
 0x2bb   :  { %v261_v32 = vpop.permute.xlu1 %260 }
 0x2bc   :  { %v263_v33 = vmul.f32 %v261_v32, %v491_v1 }
 0x2be   :  { %265 = vst.msk [vmem:[#allocation8 + $0x8] sm:$0xff] %vm63_vm0, %v263_v33 }
 0x2bf   :  { %418 = shalt.err (!%p415_p10)
}
 0x2c0   :  { %279 = dma.vmem_to_hbm [thread:$0]  %s274_s19, 256, %s519_s5, [#allocation4], %s437_s29, %s437_s29, %s438_s30  }
 0x2c1   :  { %431 = dma.done.wait [#allocation4], 256  }
 0x2c2   :  { %432 = vsyncadd [#allocation4], 4294967040 }
 0x2c3   :  { %433 = dma.done.wait [#allocation10], 32  }
 0x2c4   :  { %434 = vsyncadd [#allocation10], 4294967264 }
 0x2c5   :  { %296 = vsyncpa [#allocation3], 1 }
 0x2c6   :  { %297 = vsyncpa [#allocation6], 1 }
 0x2c7   :  { %298 = vsyncpa [#allocation4], 1 }
 0x2c8   :  { %299 = vsyncpa [#allocation10], 1 }

</bundles_post_ra>
